<compile_context>
chip_gen: v7x
topology: tpu7x:2x2x1
jax: 0.10.0
libtpu: 0.0.40
codegen_flags: <defaults>
</compile_context>

<pallas_src>
import jax
import jax.numpy as jnp
import numpy as np
from jax import lax
from jax.experimental import pallas as pl
from jax.experimental.pallas import tpu as pltpu


def _round_up(x: int, m: int) -> int:
    return (x + m - 1) // m * m


def message_passing_kernel(off_ref, lo_ref, hi_ref,      # scalar prefetch (SMEM)
                           j_ref, msg_ref, base_ref,     # inputs (VMEM tiles)
                           out_ref):                     # output (VMEM tile)
    n = pl.program_id(0)
    e = pl.program_id(1)

    # Output block is resident across the whole edge axis (its index_map only
    # depends on n), so accumulate straight into it.  Initialize with the
    # residual base = nodes + deg_in * (P_j + b) at the first edge step.
    @pl.when(e == 0)
    def _():
        out_ref[...] = base_ref[...]

    # Only the [lo, hi) sub-window of this node tile's (clamped) edge-tile
    # window actually holds edges destined to rows of this node tile.
    valid = jnp.logical_and(e >= lo_ref[n], e < hi_ref[n])

    @pl.when(valid)
    def _():
        tn = out_ref.shape[0]
        te = msg_ref.shape[0]
        n0 = n * tn
        # scatter_sum(msg, j) restricted to this node tile as a one-hot matmul:
        #   onehot[r, c] = (j[c] - n0 == r);  y = onehot @ msg   on the MXU.
        # The scalar tile offset is subtracted on the (1, tE) index row (cheap)
        # instead of being added across the full (tN, tE) iota.
        rows = lax.broadcasted_iota(jnp.int32, (tn, te), 0)
        onehot = (rows == (j_ref[...] - n0)).astype(jnp.float32)
        out_ref[...] += jnp.dot(onehot, msg_ref[...],
                                preferred_element_type=jnp.float32)


def message_passing(nodes, edges, edge_indices, w, b, *,
                    tile_n: int = 256, tile_e: int = 1024):
    """nodes [N,D] f32, edges [E,De] f32, edge_indices [2,E] i32,
       w [2D+De, D] f32, b [1,D] f32  ->  [N,D] f32.

    NOTE: the grid is data-dependent (edge tiles per node tile), so the edge
    indices must be concrete; this wrapper is not meant to be jitted with
    abstract `edge_indices`.
    """
    N, D = nodes.shape
    E, De = edges.shape
    i_idx = edge_indices[0].astype(jnp.int32)
    j_idx = edge_indices[1].astype(jnp.int32)

    hp = lax.Precision.HIGHEST

    # Split the message Linear: W = [W_i ; W_j ; W_e] along the input dim, so
    # the [E, 2D+De] concat tensor is never materialized.
    w_i, w_j, w_e = w[:D], w[D:2 * D], w[2 * D:]

    # Hoisted message computation (one [E, D] tensor streamed by the kernel):
    #   msg_e = P_i[i_e] + edges_e @ W_e
    # P_j[j] + bias contributions are folded out of the edge sum:
    #   sum_{e -> j} (P_j[j] + b) == deg_in(j) * (P_j[j] + b)
    # and absorbed into the node-wise residual base.
    p_i = jnp.dot(nodes, w_i, precision=hp)                        # [N, D]
    p_j = jnp.dot(nodes, w_j, precision=hp)                        # [N, D]
    deg = jnp.zeros((N,), jnp.float32).at[j_idx].add(1.0)          # in-degree
    base = nodes + deg[:, None] * (p_j + b.reshape(1, D))          # [N, D]

    # Sort edges by destination so each node tile's incoming edges form a
    # contiguous run -> block-sparse reduction.
    perm = jnp.argsort(j_idx)
    j_s = j_idx[perm]
    msg = p_i[i_idx[perm]] + jnp.dot(edges[perm], w_e, precision=hp)  # [E, D]

    # Padded / tile-aligned shapes (lane dim -> multiple of 128).
    Dp = _round_up(D, 128)
    Nr = _round_up(N, 8)
    tN = min(tile_n, Nr)
    if Nr // tN < 2 and Nr >= 16:
        # Keep >= 2 node tiles so both v7x TensorCores get work on the
        # "parallel" node axis (harmless on single-TC v5e/v6e).
        tN = _round_up((Nr + 1) // 2, 8)
    Np = _round_up(N, tN)
    tE = min(tile_e, _round_up(E, 128))
    Ep = _round_up(E, tE)
    n_tiles, e_tiles = Np // tN, Ep // tE

    msg_p = jnp.pad(msg, ((0, Ep - E), (0, Dp - D)))
    base_p = jnp.pad(base, ((0, Np - N), (0, Dp - D)))
    # Sentinel Np for padded edges: preserves the sorted order and can never
    # match a node row (< Np), so padded edges contribute nothing.
    j_p = jnp.pad(j_s, (0, Ep - E), constant_values=Np).reshape(1, Ep)

    # Per-node-tile edge-tile windows (host side; the grid is data-dependent).
    j_host = np.asarray(j_s)
    bounds = np.arange(n_tiles + 1, dtype=np.int64) * tN
    e_start = np.searchsorted(j_host, bounds[:-1], side="left")
    e_end = np.searchsorted(j_host, bounds[1:], side="left")
    t_start = (e_start // tE).astype(np.int64)
    t_end = np.where(e_end > e_start, -(-e_end // tE), t_start).astype(np.int64)
    cnt = t_end - t_start
    max_tiles = max(int(cnt.max()), 1)
    # Clamp the window start so off[n] + e is always a valid edge-tile index;
    # the valid sub-window [lo, hi) is enforced with pl.when in the kernel.
    off = np.minimum(t_start, e_tiles - max_tiles).astype(np.int32)
    lo = (t_start - off).astype(np.int32)
    hi = (lo + cnt).astype(np.int32)

    # Cost estimate for the (block-sparse) scatter matmul.
    flops = 2 * n_tiles * max_tiles * tN * tE * Dp
    bytes_accessed = 4 * (n_tiles * max_tiles * tE * (Dp + 1) + 2 * Np * Dp)

    out_p = pl.pallas_call(
        message_passing_kernel,
        out_shape=jax.ShapeDtypeStruct((Np, Dp), jnp.float32),
        grid_spec=pltpu.PrefetchScalarGridSpec(
            num_scalar_prefetch=3,
            grid=(n_tiles, max_tiles),
            in_specs=[
                pl.BlockSpec((1, tE), lambda n, e, off, lo, hi: (0, off[n] + e)),
                pl.BlockSpec((tE, Dp), lambda n, e, off, lo, hi: (off[n] + e, 0)),
                pl.BlockSpec((tN, Dp), lambda n, e, off, lo, hi: (n, 0)),
            ],
            out_specs=pl.BlockSpec((tN, Dp), lambda n, e, off, lo, hi: (n, 0)),
        ),
        compiler_params=pltpu.CompilerParams(
            dimension_semantics=("parallel", "arbitrary"),
            vmem_limit_bytes=32 * 1024 * 1024),
        cost_estimate=pl.CostEstimate(flops=flops, transcendentals=0,
                                      bytes_accessed=bytes_accessed),
    )(jnp.asarray(off), jnp.asarray(lo), jnp.asarray(hi), j_p, msg_p, base_p)

    return out_p[:N, :D]


def message_passing_ref(nodes, edges, edge_indices, w, b):
    """Pure-JAX reference of the PyTorch forward (update=True, reduce='sum')."""
    i_idx, j_idx = edge_indices[0], edge_indices[1]
    x_ij = jnp.concatenate([nodes[i_idx], nodes[j_idx], edges], axis=-1)
    m_ij = x_ij @ w + b
    y_j = jnp.zeros_like(nodes).at[j_idx].add(m_ij)
    return nodes + y_j


def _run_case(key, N, E, D, De, **tile_kwargs):
    F_in = 2 * D + De
    k_nodes, k_edges, k_i, k_j, k_w, k_b = jax.random.split(key, 6)
    nodes = jax.random.normal(k_nodes, (N, D), dtype=jnp.float32)
    edges = jax.random.normal(k_edges, (E, De), dtype=jnp.float32)
    i_idx = jax.random.randint(k_i, (E,), 0, N, dtype=jnp.int32)
    j_idx = jax.random.randint(k_j, (E,), 0, N, dtype=jnp.int32)
    edge_indices = jnp.stack([i_idx, j_idx], axis=0)      # [2, E]
    w = jax.random.normal(k_w, (F_in, D), dtype=jnp.float32) / np.sqrt(F_in)
    b = jax.random.normal(k_b, (1, D), dtype=jnp.float32) * 0.01

    out = jax.block_until_ready(
        message_passing(nodes, edges, edge_indices, w, b, **tile_kwargs))
    ref = message_passing_ref(nodes, edges, edge_indices, w, b)
    np.testing.assert_allclose(np.asarray(out), np.asarray(ref),
                               rtol=1e-4, atol=1e-4)


if __name__ == "__main__":
    key = jax.random.PRNGKey(0)
    k0, k1, k2 = jax.random.split(key, 3)

    # Small case (matches the original module scale); two node tiles so the
    # v7x megacore path is exercised even for tiny graphs.
    _run_case(k0, N=16, E=32, D=32, De=16)

    # Larger case with deliberately small tiles to exercise the block-sparse
    # multi-tile reduction (sorted edges, per-node-tile windows, pl.when guard,
    # padding / sentinel paths).
    _run_case(k1, N=300, E=1000, D=32, De=16, tile_n=64, tile_e=128)

    # Larger case with the default (large) tiles.
    _run_case(k2, N=300, E=1000, D=32, De=16)

    print("KERNEL_OK")
</pallas_src>

<mosaic_0001>
module attributes {stable_mosaic.version = 11 : i64} {
  func.func @message_passing_kernel(%arg0: i32, %arg1: i32, %arg2: memref<2xi32, #tpu.memory_space<smem>>, %arg3: memref<2xi32, #tpu.memory_space<smem>>, %arg4: memref<2xi32, #tpu.memory_space<smem>>, %arg5: memref<1x128xi32, #tpu.memory_space<vmem>>, %arg6: memref<128x128xf32, #tpu.memory_space<vmem>>, %arg7: memref<8x128xf32, #tpu.memory_space<vmem>>, %arg8: memref<8x128xf32, #tpu.memory_space<vmem>>) attributes {dimension_semantics = [#tpu.dimension_semantics<parallel>, #tpu.dimension_semantics<arbitrary>], iteration_bounds = array<i64: 2, 1>, scalar_prefetch = 3 : i64, scratch_operands = 0 : i64, tpu.core_type = #tpu.core_type<tc>, window_params = [{transform_indices = @transform_0, window_bounds = array<i64: 1, 128>}, {transform_indices = @transform_1, window_bounds = array<i64: 128, 128>}, {transform_indices = @transform_2, window_bounds = array<i64: 8, 128>}, {transform_indices = @transform_3, window_bounds = array<i64: 8, 128>}]} {
    %c0_i32 = arith.constant 0 : i32
    %0 = arith.cmpi eq, %arg1, %c0_i32 : i32
    %1 = arith.extui %0 : i1 to i32
    %c0_i32_0 = arith.constant 0 : i32
    %2 = arith.cmpi ne, %1, %c0_i32_0 : i32
    scf.if %2 {
      %c0 = arith.constant 0 : index
      %c0_2 = arith.constant 0 : index
      %12 = vector.load %arg7[%c0, %c0_2] : memref<8x128xf32, #tpu.memory_space<vmem>>, vector<8x128xf32>
      %c0_3 = arith.constant 0 : index
      %c0_4 = arith.constant 0 : index
      %13 = vector.load %arg8[%c0_3, %c0_4] : memref<8x128xf32, #tpu.memory_space<vmem>>, vector<8x128xf32>
      tpu.vector_store %arg8[%c0_3, %c0_4], %12 {strides = array<i32>} : memref<8x128xf32, #tpu.memory_space<vmem>>, vector<8x128xf32>,
    } else {
    }
    %3 = arith.index_cast %arg0 : i32 to index
    %4 = memref.load %arg3[%3] : memref<2xi32, #tpu.memory_space<smem>>
    %5 = arith.cmpi sge, %arg1, %4 : i32
    %6 = arith.index_cast %arg0 : i32 to index
    %7 = memref.load %arg4[%6] : memref<2xi32, #tpu.memory_space<smem>>
    %8 = arith.cmpi slt, %arg1, %7 : i32
    %9 = arith.andi %5, %8 : i1
    %10 = arith.extui %9 : i1 to i32
    %c0_i32_1 = arith.constant 0 : i32
    %11 = arith.cmpi ne, %10, %c0_i32_1 : i32
    scf.if %11 {
      %c8_i32 = arith.constant 8 : i32
      %12 = arith.muli %arg0, %c8_i32 : i32
      %13 = tpu.iota {dimensions = array<i32: 0>} : vector<8x128xi32>
      %c0 = arith.constant 0 : index
      %c0_2 = arith.constant 0 : index
      %14 = vector.load %arg5[%c0, %c0_2] : memref<1x128xi32, #tpu.memory_space<vmem>>, vector<1x128xi32>
      %15 = vector.broadcast %12 : i32 to vector<1x128xi32>
      %16 = arith.subi %14, %15 : vector<1x128xi32>
      %17 = vector.broadcast %16 : vector<1x128xi32> to vector<8x128xi32>
      %18 = arith.cmpi eq, %13, %17 : vector<8x128xi32>
      %19 = arith.extui %18 : vector<8x128xi1> to vector<8x128xi32>
      %20 = arith.sitofp %19 : vector<8x128xi32> to vector<8x128xf32>
      %c0_3 = arith.constant 0 : index
      %c0_4 = arith.constant 0 : index
      %21 = vector.load %arg8[%c0_3, %c0_4] : memref<8x128xf32, #tpu.memory_space<vmem>>, vector<8x128xf32>
      %c0_5 = arith.constant 0 : index
      %c0_6 = arith.constant 0 : index
      %22 = vector.load %arg6[%c0_5, %c0_6] : memref<128x128xf32, #tpu.memory_space<vmem>>, vector<128x128xf32>
      %cst = arith.constant dense<0.000000e+00> : vector<8x128xf32>
      %23 = tpu.matmul %20, %22, %cst {dimension_numbers = #tpu.dot_dimension_numbers<[1], [0], [0], [1], [0, 0, 1, 1], [], []>} : vector<8x128xf32>, vector<128x128xf32>, vector<8x128xf32> -> vector<8x128xf32>
      %24 = arith.addf %21, %23 : vector<8x128xf32>
      %c0_7 = arith.constant 0 : index
      %c0_8 = arith.constant 0 : index
      %25 = vector.load %arg8[%c0_7, %c0_8] : memref<8x128xf32, #tpu.memory_space<vmem>>, vector<8x128xf32>
      tpu.vector_store %arg8[%c0_7, %c0_8], %24 {strides = array<i32>} : memref<8x128xf32, #tpu.memory_space<vmem>>, vector<8x128xf32>,
    } else {
    }
    return
  }
  func.func @transform_0(%arg0: i32, %arg1: i32, %arg2: memref<2xi32, #tpu.memory_space<smem>>, %arg3: memref<2xi32, #tpu.memory_space<smem>>, %arg4: memref<2xi32, #tpu.memory_space<smem>>) -> (i32, i32) {
    %0 = arith.index_cast %arg0 : i32 to index
    %1 = memref.load %arg2[%0] : memref<2xi32, #tpu.memory_space<smem>>
    %2 = arith.addi %1, %arg1 : i32
    %c0_i32 = arith.constant 0 : i32
    %c0_i32_0 = arith.constant 0 : i32
    return %c0_i32, %2 : i32, i32
  }
  func.func @transform_1(%arg0: i32, %arg1: i32, %arg2: memref<2xi32, #tpu.memory_space<smem>>, %arg3: memref<2xi32, #tpu.memory_space<smem>>, %arg4: memref<2xi32, #tpu.memory_space<smem>>) -> (i32, i32) {
    %0 = arith.index_cast %arg0 : i32 to index
    %1 = memref.load %arg2[%0] : memref<2xi32, #tpu.memory_space<smem>>
    %2 = arith.addi %1, %arg1 : i32
    %c0_i32 = arith.constant 0 : i32
    %c0_i32_0 = arith.constant 0 : i32
    return %2, %c0_i32 : i32, i32
  }
  func.func @transform_2(%arg0: i32, %arg1: i32, %arg2: memref<2xi32, #tpu.memory_space<smem>>, %arg3: memref<2xi32, #tpu.memory_space<smem>>, %arg4: memref<2xi32, #tpu.memory_space<smem>>) -> (i32, i32) {
    %c0_i32 = arith.constant 0 : i32
    %c0_i32_0 = arith.constant 0 : i32
    return %arg0, %c0_i32 : i32, i32
  }
  func.func @transform_3(%arg0: i32, %arg1: i32, %arg2: memref<2xi32, #tpu.memory_space<smem>>, %arg3: memref<2xi32, #tpu.memory_space<smem>>, %arg4: memref<2xi32, #tpu.memory_space<smem>>) -> (i32, i32) {
    %c0_i32 = arith.constant 0 : i32
    %c0_i32_0 = arith.constant 0 : i32
    return %arg0, %c0_i32 : i32, i32
  }
}

</mosaic_0001>

<bundles_post_ra>
// kernel: tpu_custom_call.1
= control target key start
LH: loop header
LB: loop body
LE: loop exit
PB: predicated region body
PF: predicated region fallthrough
CT: control target
= control target key end

     0   :  { %s1405_s0 = inlined_call_operand.hbm [shape: s32[2], index: 0, kind: input, shape index: {}]   ;;  %s1406_s3 = inlined_call_operand.hbm [shape: s32[1,128], index: 3, kind: input, shape index: {}]   ;;  %s1407_s4 = inlined_call_operand.hbm [shape: f32[128,128], index: 4, kind: input, shape index: {}]   ;;  %s1408_s5 = inlined_call_operand.vmem [shape: f32[16,128], index: 5, kind: input, shape index: {}]   ;;  %s1409_s6 = inlined_call_operand.hbm [shape: f32[16,128], index: 6, kind: output, shape index: {}]   ;;  %s1410_s1 = inlined_call_operand.vmem [shape: s32[2], index: 1, kind: input, shape index: {}]   ;;  %s1411_s2 = inlined_call_operand.vmem [shape: s32[2], index: 2, kind: input, shape index: {}]  }
   0x1   :  { %s756_s23 = scalar_lea.hbm %s1405_s0, 16 }
   0x2   :  { %p757_p0 = scmp.ne.s32.totalorder %s1405_s0, %s756_s23  ;;  %p760_p1 = scmp.lt.u32.totalorder %s756_s23, %s1405_s0 }
   0x4   :  { %p762_p2 = pnand %p760_p1, %p757_p0 }
   0x6   :  { %765 = shalt.err (!%p762_p2)  }
   0x7   :  { %s988_s28 = smov [#allocation3]   ;;  %s13_s9 = sshll.u32 %s1410_s1, 4  ;;  %s14_s9 = int_to_ptr.vmem [resolvable:$true] %s13_s9 }
   0x8   :  { %12 = dma.hbm_to_smem %s1405_s0, 16, %s988_s28, [#allocation2] }
   0x9   :  { %s17_s12 = sshll.u32 %s1411_s2, 4  ;;  %s766_s13 = scalar_lea.vmem %s14_s9, 16  ;;  %s18_s12 = int_to_ptr.vmem [resolvable:$true] %s17_s12 }
   0xa   :  { %p767_p3 = scmp.ne.s32.totalorder %s14_s9, %s766_s13  ;;  %p771_p4 = scmp.lt.s32.totalorder %s14_s9, %s14_s9 }
   0xb   :  { %p772_p5 = scmp.lt.s32.totalorder %s766_s13, %s766_s13 }
   0xd   :  { %p773_p6 = por %p772_p5, %p771_p4 }
   0xf   :  { %p774_p7 = pnand %p773_p6, %p767_p3 }
  0x11   :  { %777 = shalt.err (!%p774_p7)  }
  0x12   :  { %s989_s14 = smov [#allocation4]   ;;  %s778_s0 = scalar_lea.vmem %s18_s12, 16 }
  0x13   :  { %16 = dma.vmem_to_smem %s14_s9, 16, %s989_s14, [#allocation2] }
  0x14   :  { %p779_p8 = scmp.ne.s32.totalorder %s18_s12, %s778_s0  ;;  %p783_p9 = scmp.lt.s32.totalorder %s18_s12, %s18_s12 }
  0x15   :  { %p784_p10 = scmp.lt.s32.totalorder %s778_s0, %s778_s0 }
  0x17   :  { %p785_p11 = por %p784_p10, %p783_p9 }
  0x19   :  { %p786_p12 = pnand %p785_p11, %p779_p8 }
  0x1b   :  { %789 = shalt.err (!%p786_p12)  }
  0x1c   :  { %s990_s1 = smov [#allocation5]  }
  0x1d   :  { %20 = dma.vmem_to_smem %s18_s12, 16, %s990_s1, [#allocation2] }
  0x1e   :  { %926 = dma.done.wait [#allocation2], 48 }
  0x1f   :  { %927 = vsyncadd [#allocation2], 4294967248 }
  0x20   :  { %22 = sfence }
  0x21   :  { %23 = vsyncpa [#allocation7], 0 }
  0x22   :  { %25 = vsyncpa [#allocation7 + $0x1], 0 }
  0x23   :  { %26 = vsyncpa [#allocation10], 0 }
  0x24   :  { %28 = vsyncpa [#allocation10 + $0x1], 0 }
  0x25   :  { %29 = vsyncpa [#allocation8], 0 }
  0x26   :  { %31 = vsyncpa [#allocation8 + $0x1], 0  ;;  %s1053_s2 = smov 0   ;;  %s1055_s15 = smov 0  }
  0x27   :  { %s1057_s16 = smov 0   ;;  %s1059_s17 = smov 0  }
  0x28   :  { %s1061_s18 = smov 0   ;;  %s1063_s19 = smov 0  }
  0x29   :  { %s1065_s20 = smov 0   ;;  %s1067_s21 = smov 0  }
  0x2a   :  { %s1069_s22 = smov 0   ;;  %s1071_s23 = smov 0  }
  0x2b   :  { %s1073_s24 = smov 0   ;;  %s1075_s25 = smov 0  }
  0x2c LB: > { %1420 = sst [smem:[#allocation20_spill]] %s950_s16  ;;  %s526_s26 = sadd.s32 4294967295, %s986_s25   ;;  %s986_s25 = sphi %s1075_s25, %s37_s25   ;;  %s982_s24 = sphi %s1073_s24, %s1460_s24   ;;  %s978_s23 = sphi %s1071_s23, %s1459_s23   ;;  %s974_s22 = sphi %s1069_s22, %s1449_s22   ;;  %s970_s21 = sphi %s1067_s21, %s1458_s21   ;;  %s966_s20 = sphi %s1065_s20, %s1457_s20   ;;  %s962_s19 = sphi %s1063_s19, %s1456_s19   ;;  %s958_s18 = sphi %s1061_s18, %s1455_s18   ;;  %s954_s17 = sphi %s1059_s17, %s1454_s17   ;;  %s950_s16 = sphi %s1057_s16, %s1453_s16   ;;  %s946_s15 = sphi %s1055_s15, %s1452_s15   ;;  %s942_s2 = sphi %s1053_s2, %s1451_s2  }
  0x2d   : > { %1421 = sst [smem:[#allocation21_spill]] %s974_s22  ;;  %s527_s27 = sadd.s32 4294967294, %s986_s25  }
  0x2e   : > { %s49_s28 = sadd.s32 1, %s982_s24  ;;  %s53_s29 = sld [smem:[#allocation3 + %s982_s24]] }
  0x2f   : > { %p51_p13 = scmp.ge.s32.totalorder %s49_s28, 2  ;;  %s60_s30 = sadd.s32 1, %s974_s22 }
  0x30   : > { %p67_p0 = scmp.ne.s32.totalorder %s974_s22, %s970_s21  ;;  %p1417_p1 = scmp.eq.s32.totalorder %s986_s25, 0 }
  0x31   : > { %s1462_s28 = smov (%p51_p13, %s49_s28), 0  ;;  %p73_p3 = scmp.ne.s32.totalorder %s970_s21, %s966_s20 }
  0x32   : > { %1422 = sst [smem:[#allocation22_spill]] %s1462_s28  ;;  %p1123_p2 = por %p1417_p1, %p67_p0 }
  0x33   : > { %s55_s8 = sld [smem:[#allocation3 + %s1462_s28]]  ;;  %p1129_p4 = scmp.eq.s32.totalorder %s526_s26, 0 }
  0x34   : > { %s1134_s10 = sld [smem:[#allocation3 + %s982_s24]]  ;;  %s139_s11 = ssub.s32 %s982_s24, %s1462_s28 }
  0x35   : > { %p1140_p5 = por %p1129_p4, %p73_p3  ;;  %p140_p6 = scmp.eq.s32.totalorder %s139_s11, 0 }
  0x36   : > { %s142_s13 = sadd.s32 1, %s950_s16  ;;  %p152_p7 = scmp.ne.s32.totalorder %s950_s16, %s946_s15 }
  0x37   : > { %s1425_s12 = scalar_select %p1140_p5, 1, 0 }
  0x38   : > { %s1148_s14 = scalar_select %p140_p6, %s950_s16, %s142_s13  }
  0x39   : > { %p153_p8 = scmp.eq.s32.totalorder %s526_s26, 1  ;;  %p158_p9 = scmp.ne.s32.totalorder %s946_s15, %s942_s2 }
  0x3a   : > { %1426 = sst [smem:[#allocation23_spill]] %s1148_s14  ;;  %s57_s0 = ssub.s32 %s53_s29, %s55_s8 }
  0x3b   : > { %p159_p10 = scmp.eq.s32.totalorder %s527_s27, 1  ;;  %p58_p11 = scmp.eq.s32.totalorder %s57_s0, 0 }
  0x3c   : > { %p1152_p12 = por %p153_p8, %p152_p7  ;;  %p1416_p3 = scmp.lt.s32.totalorder %s986_s25, 2 }
  0x3d   : > { %p1156_p13 = por %p159_p10, %p158_p9  ;;  %s179_s26 = sand.u32 1, %s974_s22  }
  0x3e   : > { %s1427_s1 = scalar_select %p1152_p12, 1, 0 }
  0x3f   : > { %s1428_s20 = scalar_select %p1156_p13, 1, 0 }
  0x40   : > { %s1162_s11 = scalar_select %p58_p11, %s974_s22, %s60_s30  }
  0x41   : > { %1429 = sst [smem:[#allocation24_spill]] %s1428_s20  ;;  %s182_s8 = scalar_lea.vmem [#allocation6], %s179_s26 }
  0x42   : > { %1430 = sst [smem:[#allocation25_spill]] %s1162_s11  ;;  %s191_s13 = sshll.u32 %s182_s8, 4  ;;  %s1183_s13 = int_to_ptr.vmem [resolvable:$true] %s191_s13 }
  0x43   : > { %s624_s29 = scalar_select %p1123_p2, [#allocation3], [#allocation12] }
  0x44   : > { %s625_s27 = scalar_select %p1123_p2, %s982_s24, 0 }
  0x45   : > { %s1464_s29 = smov (!%p1416_p3, %s624_s29), [#allocation14]  ;;  %p1179_p6 = pnand %p1416_p3, %p1123_p2 }
  0x46   : > { %s1466_s27 = smov (!%p1416_p3, %s625_s27), 0  ;;  %p534_p7 = scmp.ge.s32.totalorder %s986_s25, 1 }
  0x47   : > { %s183_s30 = sld [smem:[%s1464_s29 + %s1466_s27]]  ;;  %p226_p8 = scmp.lt.s32.totalorder %s986_s25, 3 }
  0x48   : > { %s1192_s14 = sld [smem:[#allocation3 + %s1462_s28]]  ;;  %s180_s29 = scalar_lea.sflag [#allocation7], %s179_s26 }
  0x49   : > { %p1187_p9 = pnand %p534_p7, %p226_p8  ;;  %p792_p10 = pneg %p1179_p6 }
  0x4a   : > { %s795_s20 = scalar_lea.hbm %s1406_s3, 16 }
  0x4b   : > { %s1432_s11 = scalar_select %p1187_p9, 1, 0 }
  0x4d   : > { %s530_s22 = sshll.u32 %s183_s30, 4 }
  0x4e   : > { %s1197_s16 = scalar_lea.hbm %s1406_s3, %s530_s22 }
  0x4f   : > { %s790_s27 = scalar_lea.hbm %s1197_s16, 16  ;;  %p796_p8 = scmp.lt.u32.totalorder %s1197_s16, %s1406_s3 }
  0x50   : > { %p791_p2 = scmp.ne.s32.totalorder %s1197_s16, %s790_s27  ;;  %p797_p0 = scmp.lt.u32.totalorder %s795_s20, %s790_s27 }
  0x51   : > { %p799_p1 = scmp.lt.u32.totalorder %s790_s27, %s1197_s16 }
  0x52   : > { %p793_p11 = pnand %p792_p10, %p791_p2  ;;  %p798_p3 = por %p797_p0, %p796_p8 }
  0x54   : > { %p794_p7 = pneg %p793_p11  ;;  %p800_p13 = por %p799_p1, %p798_p3 }
  0x56   : > { %p801_p12 = pnand %p800_p13, %p794_p7 }
  0x58   : > { %804 = shalt.err (!%p801_p12)
}
  0x59   : > { %s805_s26 = scalar_lea.vmem %s1183_s13, 16  ;;  %s991_s28 = smov [#allocation6]  }
  0x5a   : > { %p806_p2 = scmp.ne.s32.totalorder %s1183_s13, %s805_s26  ;;  %s810_s8 = sshll.u32 %s991_s28, 4  ;;  %s811_s8 = int_to_ptr.vmem [resolvable:$false] %s810_s8 }
  0x5b   : > { %s812_s30 = scalar_lea.vmem %s811_s8, 32  ;;  %p813_p9 = scmp.lt.s32.totalorder %s1183_s13, %s811_s8 }
  0x5c   : > { %p808_p11 = pnand %p806_p2, %p792_p10  ;;  %p814_p0 = scmp.lt.s32.totalorder %s812_s30, %s805_s26 }
  0x5e   : > { %p809_p5 = pneg %p808_p11  ;;  %p815_p8 = por %p814_p0, %p813_p9 }
  0x60   : > { %p816_p1 = pnand %p815_p8, %p809_p5 }
  0x62   : > { %819 = shalt.err (!%p816_p1)
}
  0x63   : > { %639 = dma.hbm_to_vmem [thread:$0]  (!%p1179_p6), %s1197_s16, 16, %s1183_s13, %s180_s29  }
  0x64   : > { %p97_p5 = scmp.ne.s32.totalorder %s962_s19, %s958_s18  ;;  %p103_p12 = scmp.ne.s32.totalorder %s958_s18, %s954_s17 }
  0x65   : > { %s90_s20 = sadd.s32 1, %s962_s19  ;;  %s198_s27 = sand.u32 1, %s962_s19  }
  0x66   : > { %p1231_p13 = por %p103_p12, %p1129_p4  ;;  %s87_s7 = ssub.s32 %s1134_s10, %s1192_s14 }
  0x67   : > { %p1434_p3 = scmp.eq.s32.totalorder %s986_s25, 0  ;;  %p88_p10 = scmp.eq.s32.totalorder %s87_s7, 0 }
  0x68   : > { %s531_s22 = sshll.u32 %s198_s27, 7  ;;  %p1435_p7 = scmp.lt.s32.totalorder %s986_s25, 2 }
  0x69   : > { %p99_p9 = por %p97_p5, %p1434_p3  ;;  %s202_s14 = scalar_lea.vmem [#allocation9], %s531_s22 }
  0x6a   : > { %s1247_s16 = scalar_select %p88_p10, %s962_s19, %s90_s20  }
  0x6b   : > { %p1242_p2 = pnand %p1435_p7, %p99_p9  ;;  %p1437_p4 = pmov %p1435_p7 }
  0x6c   : > { %s627_s17 = scalar_select %p99_p9, [#allocation3], [#allocation13] }
  0x6d   : > { %s628_s9 = scalar_select %p99_p9, %s982_s24, 0 }
  0x6e   : > { %s1468_s17 = smov (!%p1437_p4, %s627_s17), [#allocation15]  ;;  %p1438_p6 = pmov %p1437_p4 }
  0x6f   : > { %s211_s13 = sshll.u32 %s202_s14, 4  ;;  %s1261_s20 = scalar_lea.sflag [#allocation10], %s198_s27  ;;  %s1254_s13 = int_to_ptr.vmem [resolvable:$true] %s211_s13 }
  0x70   : > { %s1470_s9 = smov (!%p1438_p6, %s628_s9), 0  ;;  %p822_p0 = pneg %p1242_p2 }
  0x71   : > { %s203_s10 = sld [smem:[%s1468_s17 + %s1470_s9]]  ;;  %s825_s9 = scalar_lea.hbm %s1407_s4, 2048 }
  0x77   : > { %s547_s29 = sshll.u32 %s203_s10, 11 }
  0x78   : > { %s1259_s30 = scalar_lea.hbm %s1407_s4, %s547_s29 }
  0x79   : > { %s820_s7 = scalar_lea.hbm %s1259_s30, 2048  ;;  %p826_p5 = scmp.lt.u32.totalorder %s1259_s30, %s1407_s4 }
  0x7a   : > { %p821_p11 = scmp.ne.s32.totalorder %s1259_s30, %s820_s7  ;;  %p827_p12 = scmp.lt.u32.totalorder %s825_s9, %s820_s7 }
  0x7b   : > { %p829_p9 = scmp.lt.u32.totalorder %s820_s7, %s1259_s30 }
  0x7c   : > { %p823_p8 = pnand %p822_p0, %p821_p11  ;;  %p828_p3 = por %p827_p12, %p826_p5 }
  0x7e   : > { %p824_p1 = pneg %p823_p8  ;;  %p830_p10 = por %p829_p9, %p828_p3 }
  0x80   : > { %p831_p7 = pnand %p830_p10, %p824_p1 }
  0x82   : > { %834 = shalt.err (!%p831_p7)
}
  0x83   : > { %s835_s27 = scalar_lea.vmem %s1254_s13, 2048  ;;  %s992_s29 = smov [#allocation9]  }
  0x84   : > { %p836_p4 = scmp.ne.s32.totalorder %s1254_s13, %s835_s27  ;;  %s840_s28 = sshll.u32 %s992_s29, 4  ;;  %s841_s28 = int_to_ptr.vmem [resolvable:$false] %s840_s28 }
  0x85   : > { %s842_s8 = scalar_lea.vmem %s841_s28, 4096  ;;  %p843_p8 = scmp.lt.s32.totalorder %s1254_s13, %s841_s28 }
  0x86   : > { %p838_p6 = pnand %p836_p4, %p822_p0  ;;  %p844_p5 = scmp.lt.s32.totalorder %s842_s8, %s835_s27 }
  0x88   : > { %p839_p11 = pneg %p838_p6  ;;  %p845_p12 = por %p844_p5, %p843_p8 }
  0x8a   : > { %p846_p3 = pnand %p845_p12, %p839_p11 }
  0x8c   : > { %849 = shalt.err (!%p846_p3)
}
  0x8d   : > { %s993_s7 = smov 128   ;;  %s994_s22 = smov 8  }
  0x8e   : > { %644 = dma.hbm_to_vmem [thread:$0]  (!%p1242_p2), %s1259_s30, 2048, %s1254_s13, %s1261_s20, %s993_s7, %s993_s7, %s994_s22  }
  0x8f   : > { %p1439_p0 = scmp.ne.s32.totalorder %s1432_s11, 0 }
  0x90   : > { %s232_s17 = sand.u32 (!%p1439_p0), 1, %s970_s21   ;;  %p1440_p1 = scmp.ne.s32.totalorder (!%p1439_p0), %s1425_s12, 0 }
  0x91   : > { %230 = sbr.rel (%p1439_p0) target bundleno = 442 (0x1ba), region = 32  ;;  %s233_s9 = scalar_lea.sflag (!%p1439_p0), [#allocation7], %s232_s17 }
  0x92   : > { %s1292_s10 = scalar_lea.vmem (!%p1439_p0), [#allocation6], %s232_s17 }
  0x98   : > { %929 = dma.done.wait (%p1440_p1), %s233_s9, 16  }
  0x99   : > { %931 = vsyncadd (%p1440_p1), %s233_s9, 4294967280  ;;  %s240_s14 = sand.u32 1, %s958_s18  }
  0x9a   : > { %s535_s27 = sshll.u32 %s240_s14, 7  ;;  %s241_s26 = scalar_lea.sflag [#allocation10], %s240_s14 }
  0x9b   : > { %s1299_s13 = scalar_lea.vmem [#allocation9], %s535_s27 }
  0x9c   : > { %933 = dma.done.wait (%p1231_p13), %s241_s26, 2048  }
  0x9d   : > { %935 = vsyncadd (%p1231_p13), %s241_s26, 4294965248  ;;  %s272_s12 = sand.u32 1, %s946_s15   ;;  %p280_p2 = scmp.lt.s32.totalorder %s978_s23, 1 }
  0x9e   : > { %s290_s11 = sld [smem:[#allocation4 + %s978_s23]]  ;;  %s536_s20 = sshll.u32 %s272_s12, 3 }
  0x9f   : > { %s292_s30 = sld [smem:[#allocation5 + %s978_s23]]  ;;  %s1315_s22 = scalar_lea.vmem [#allocation11], %s536_s20 }
  0xa0   : > { %s281_s29 = scalar_select %p280_p2, %s978_s23, 1 }
  0xa2   : > { %s537_s28 = sshll.u32 %s281_s29, 3 }
  0xa3   : > { %s283_s0 = scalar_lea.vmem %s1408_s5, %s537_s28 }
  0xa4   : > { %p538_p9 = scmp.le.s32.totalorder %s290_s11, 0  ;;  %v288_v0 = vld [vmem:[%s283_s0] sm:$0xff] }
  0xa5   : > { %p539_p10 = scmp.gt.s32.totalorder %s292_s30, 0  ;;  %289 = vst [vmem:[%s1315_s22] sm:$0xff] %v288_v0 }
  0xa7   : > { %p294_p13 = pnand %p539_p10, %p538_p9 }
  0xa8   : > { %v312_v1 = vld [vmem:[%s1299_s13] sm:$0xff] (!%p294_p13)  ;;  %v313_v2 = vld [vmem:[%s1299_s13 + $0x8] sm:$0xff] (!%p294_p13)  ;;  %v314_v3 = vld [vmem:[%s1299_s13 + $0x10] sm:$0xff] (!%p294_p13)  ;;  %v995_v4 = vmov (!%p294_p13), 0.0|0.0   ;;  %vm996_vm0 = vmmov (!%p294_p13), 0   ;;  %v997_v7 = vmov (!%p294_p13), 0.0   ;;  %v299_v18 = vlaneseq (!%p294_p13) }
  0xa9   : > { %297 = sbr.rel (%p294_p13) target bundleno = 417 (0x1a1), region = 48  ;;  %600 = vmatprep.subr.bf16.mxu0 (!%p294_p13), %v995_v4  ;;  %v601_v5 = vpack.c.bf16 (!%p294_p13), %v313_v2, %v312_v1  ;;  %v315_v6 = vld [vmem:[%s1299_s13 + $0x18] sm:$0xff] (!%p294_p13)  ;;  %597 = vmatprep.mubr.msk.f32.mxu0 (!%p294_p13), %vm996_vm0, %v997_v7  ;;  %v316_v9 = vld [vmem:[%s1299_s13 + $0x20] sm:$0xff] (!%p294_p13)  ;;  %v317_v10 = vld [vmem:[%s1299_s13 + $0x28] sm:$0xff] (!%p294_p13)  ;;  %s540_s17 = sshll.u32 (!%p294_p13), %s978_s23, 3  ;;  %v998_v34 = vmov (!%p294_p13), 1.0  }
  0xaa   : > { %v604_v8 = vpack.c.bf16 (!%p294_p13), %v315_v6, %v314_v3  ;;  %v607_v11 = vpack.c.bf16 (!%p294_p13), %v317_v10, %v316_v9  ;;  %v318_v12 = vld [vmem:[%s1299_s13 + $0x30] sm:$0xff] (!%p294_p13)  ;;  %v319_v13 = vld [vmem:[%s1299_s13 + $0x38] sm:$0xff] (!%p294_p13)  ;;  %v320_v15 = vld [vmem:[%s1299_s13 + $0x40] sm:$0xff] (!%p294_p13)  ;;  %v300_v22 = vshrl.u32 (!%p294_p13), %v299_v18, 7  ;;  %v302_v26 = vstv (!%p294_p13), %s540_s17 }
  0xab   : > { %602 = vmatpush3.bf16.msra.mxu0 (!%p294_p13), %v601_v5  ;;  %v610_v14 = vpack.c.bf16 (!%p294_p13), %v319_v13, %v318_v12  ;;  %v321_v16 = vld [vmem:[%s1299_s13 + $0x48] sm:$0xff] (!%p294_p13)  ;;  %v322_v19 = vld [vmem:[%s1299_s13 + $0x50] sm:$0xff] (!%p294_p13)  ;;  %v323_v20 = vld [vmem:[%s1299_s13 + $0x58] sm:$0xff] (!%p294_p13) }
  0xac   : > { %603 = vmatprep.subr.bf16.mxu0 (!%p294_p13), %v995_v4  ;;  %v613_v17 = vpack.c.bf16 (!%p294_p13), %v321_v16, %v320_v15  ;;  %v616_v21 = vpack.c.bf16 (!%p294_p13), %v323_v20, %v322_v19  ;;  %v324_v23 = vld [vmem:[%s1299_s13 + $0x60] sm:$0xff] (!%p294_p13)  ;;  %v325_v24 = vld [vmem:[%s1299_s13 + $0x68] sm:$0xff] (!%p294_p13)  ;;  %v306_v29 = vsub.s32 (!%p294_p13), 0, %v300_v22  ;;  %v326_v30 = vld [vmem:[%s1299_s13 + $0x70] sm:$0xff] (!%p294_p13) }
  0xad   : > { %v301_v25 = vld [vmem:[%s1292_s10] sm:$0x1] (!%p294_p13)  ;;  %v619_v27 = vpack.c.bf16 (!%p294_p13), %v325_v24, %v324_v23  ;;  %v327_v31 = vld [vmem:[%s1299_s13 + $0x78] sm:$0xff] (!%p294_p13) }
  0xae   : > { %v303_v28 = vsub.s32 (!%p294_p13), %v301_v25, %v302_v26  ;;  %v622_v32 = vpack.c.bf16 (!%p294_p13), %v327_v31, %v326_v30  ;;  %v311_v35 = vld [vmem:[%s1315_s22] sm:$0xff] (!%p294_p13) }
  0xaf   : > { %605 = vmatpush3.bf16.msra.mxu0 (!%p294_p13), %v604_v8 }
  0xb0   : > { %606 = vmatprep.subr.bf16.mxu0 %v995_v4  ;;  %v307_v33 = vrot.slane %v303_v28, %v306_v29 }
  0xb2   : > { %vm308_vm1 = vcmp.eq.s32.totalorder %v300_v22, %v307_v33 }
  0xb3   : > { %608 = vmatpush3.bf16.msra.mxu0 %v607_v11 }
  0xb4   : > { %609 = vmatprep.subr.bf16.mxu0 %v995_v4 }
  0xb7   : > { %611 = vmatpush3.bf16.msra.mxu0 %v610_v14 }
  0xb8   : > { %612 = vmatprep.subr.bf16.mxu0 %v995_v4 }
  0xbb   : > { %614 = vmatpush3.bf16.msra.mxu0 %v613_v17 }
  0xbc   : > { %615 = vmatprep.subr.bf16.mxu0 %v995_v4 }
  0xbf   : > { %617 = vmatpush3.bf16.msra.mxu0 %v616_v21 }
  0xc0   : > { %618 = vmatprep.subr.bf16.mxu0 %v995_v4 }
  0xc3   : > { %620 = vmatpush3.bf16.msra.mxu0 %v619_v27 }
  0xc4   : > { %621 = vmatprep.subr.bf16.mxu0 %v995_v4 }
  0xc7   : > { %623 = vmatpush3.bf16.msra.mxu0 %v622_v32 }
  0xca   : > { %598 = vmatmul.mubr.msk.f32.vlgmr.msra.gmra.mrb[0].mxu0 %vm308_vm1, %v998_v34 }
 0x19d   : > { %v394_v36 = vpop.f32.mrb[0].mxu0 }
 0x19e   : > { %v398_v37 = vadd.f32 %v394_v36, %v311_v35  ;;  %v599_v38 = vpop.f32.mrb[1].mxu0 }
 0x1a0   : > { %399 = vst [vmem:[%s1315_s22] sm:$0xff] %v398_v37 }
 0x1a1 PF: > { %s544_s9 = sshll.u32 %s978_s23, 7  ;;  %s414_s26 = sshll.u32 %s1315_s22, 4  ;;  %s415_s26 = int_to_ptr.vmem [resolvable:$true] %s414_s26 }
 0x1a2   : > { %s1342_s27 = scalar_lea.hbm %s1409_s6, %s544_s9  ;;  %s401_s13 = scalar_lea.sflag [#allocation8], %s272_s12 }
 0x1a3   : > { %s850_s11 = scalar_lea.vmem %s415_s26, 128  ;;  %p1441_p4 = scmp.ne.s32.totalorder %s1427_s1, 0 }
 0x1a4   : > { %p851_p7 = scmp.ne.s32.totalorder %s415_s26, %s850_s11  ;;  %s999_s30 = smov [#allocation11]  }
 0x1a5   : > { %s854_s20 = sshll.u32 %s999_s30, 4  ;;  %s855_s20 = int_to_ptr.vmem [resolvable:$false] %s854_s20 }
 0x1a6   : > { %p852_p6 = pnand %p851_p7, %p1441_p4  ;;  %s856_s29 = scalar_lea.vmem %s855_s20, 256 }
 0x1a7   : > { %p857_p8 = scmp.lt.s32.totalorder %s415_s26, %s855_s20  ;;  %p858_p5 = scmp.lt.s32.totalorder %s856_s29, %s850_s11 }
 0x1a8   : > { %p853_p11 = pneg %p852_p6 }
 0x1a9   : > { %p859_p12 = por %p858_p5, %p857_p8 }
 0x1ab   : > { %p860_p3 = pnand %p859_p12, %p853_p11 }
 0x1ad   : > { %863 = shalt.err (!%p860_p3)
}
 0x1ae   : > { %s864_s23 = scalar_lea.hbm %s1342_s27, 128  ;;  %s868_s8 = scalar_lea.hbm %s1409_s6, 256 }
 0x1af   : > { %p865_p0 = scmp.ne.s32.totalorder %s1342_s27, %s864_s23  ;;  %p869_p9 = scmp.lt.u32.totalorder %s1342_s27, %s1409_s6 }
 0x1b0   : > { %p870_p10 = scmp.lt.u32.totalorder %s868_s8, %s864_s23  ;;  %p872_p7 = scmp.lt.u32.totalorder %s864_s23, %s1342_s27 }
 0x1b1   : > { %p866_p1 = pnand %p865_p0, %p1441_p4 }
 0x1b2   : > { %p871_p13 = por %p870_p10, %p869_p9 }
 0x1b3   : > { %p867_p2 = pneg %p866_p1 }
 0x1b4   : > { %p873_p6 = por %p872_p7, %p871_p13 }
 0x1b6   : > { %p874_p11 = pnand %p873_p6, %p867_p2 }
 0x1b8   : > { %877 = shalt.err (!%p874_p11)
}
 0x1b9   : > { %632 = dma.vmem_to_hbm [thread:$0]  (%p1441_p4), %s415_s26, 128, %s1342_s27, %s401_s13  }
 0x1ba PF: > { %s1442_s22 = sld [smem:[#allocation24_spill]]  ;;  %s426_s17 = sand.u32 1, %s942_s2  }
 0x1bb   : > { %p1444_p5 = scmp.ge.s32.totalorder %s986_s25, 2  ;;  %s427_s9 = scalar_lea.sflag [#allocation8], %s426_s17 }
 0x1c0   : > { %p1443_p8 = scmp.ne.s32.totalorder %s1442_s22, 0 }
 0x1c2   : > { %p646_p12 = pnand %p1444_p5, %p1443_p8 }
 0x1c4   : > { %937 = dma.done.wait (!%p646_p12), %s427_s9, 128  }
 0x1c5   : > { %939 = vsyncadd (!%p646_p12), %s427_s9, 4294967168  ;;  %s37_s25 = sadd.s32 1, %s986_s25   ;;  %s1445_s10 = sld [smem:[#allocation20_spill]] }
 0x1c6   : > { %p34_p3 = scmp.ge.s32.totalorder %s37_s25, 4   ;;  %s1446_s14 = sld [smem:[#allocation23_spill]] }
 0x1c7   : > { %s1447_s1 = smov %s1247_s16  ;;  %s1448_s27 = sld [smem:[#allocation21_spill]] }
 0x1c8   : > { %s1449_s22 = sld [smem:[#allocation25_spill]]  ;;  %s1450_s26 = sld [smem:[#allocation22_spill]] }
 0x1c9   : > { %s1451_s2 = smov %s946_s15  ;;  %s1454_s17 = smov %s958_s18 }
 0x1ca   : > { %s1455_s18 = smov %s962_s19  ;;  %s1456_s19 = smov %s1447_s1 }
 0x1cb   : > { %s1452_s15 = smov %s1445_s10  ;;  %s1457_s20 = smov %s970_s21 }
 0x1cc   : > { %s1453_s16 = smov %s1446_s14  ;;  %s1459_s23 = smov %s982_s24 }
 0x1cd   : > { %s1458_s21 = smov %s1448_s27  ;;  %36 = sbr.rel (!%p34_p3) target bundleno = 44 (0x2c), region = 101 }
 0x1ce   : > { %s1460_s24 = smov %s1450_s26 }
 0x1d4   :  { %432 = vsyncpa [#allocation7], 1 }
 0x1d5   :  { %434 = vsyncpa [#allocation7 + $0x1], 1 }
 0x1d6   :  { %435 = vsyncpa [#allocation10], 1 }
 0x1d7   :  { %437 = vsyncpa [#allocation10 + $0x1], 1 }
 0x1d8   :  { %438 = vsyncpa [#allocation8], 1 }
 0x1d9   :  { %440 = vsyncpa [#allocation8 + $0x1], 1 }

</bundles_post_ra>
